<compile_context>
chip_gen: v7x
topology: tpu7x:2x2x1
jax: 0.10.0
libtpu: 0.0.40
codegen_flags: <defaults>
</compile_context>

<pallas_src>
import functools

import numpy as np
import jax
import jax.numpy as jnp
from jax.experimental import pallas as pl
from jax.experimental.pallas import tpu as pltpu


def _kme_kernel(scale_ref, x_ref, w_ref, out_ref, *, d_half, set_size):
    # scale_ref: (1,)                      f32 SMEM  (learnable 1/gamma scalar)
    # x_ref:     (b_tile, s_tile, N_dims)  VMEM      (input dtype; f32 or bf16)
    # w_ref:     (N_dims, d_half)          f32 VMEM  (shared random projection, resident)
    # out_ref:   (b_tile, 2*d_half)        f32 VMEM  (resident accumulator across set axis)
    j = pl.program_id(1)

    @pl.when(j == 0)
    def _init():
        out_ref[...] = jnp.zeros_like(out_ref)

    scale = scale_ref[0]

    x = x_ref[...]
    if x.dtype != jnp.float32:
        x = x.astype(jnp.float32)  # bf16 streamed from HBM, upcast on the VPU (free here)

    # Batched MXU matmul; scale applied post-matmul on the small result:
    # O(b*s*d_half) VALU work instead of rescaling W every step.
    xw = jnp.einsum("bsn,nd->bsd", x, w_ref[...],
                    preferred_element_type=jnp.float32) * scale

    # Partial sums of the set-mean; cos | sin halves reduced & stored independently
    # (no (S, d) concat / cross-lane shuffle).
    out_ref[:, :d_half] += jnp.sum(jnp.cos(xw), axis=1)
    out_ref[:, d_half:] += jnp.sum(jnp.sin(xw), axis=1)

    @pl.when(j == pl.num_programs(1) - 1)
    def _finalize():
        out_ref[...] = out_ref[...] * jnp.float32(1.0 / set_size)


def _choose_tiles(batch, set_size, N_dims, itemsize, budget):
    """Pick (b_tile, s_tile) so the x block stays under `budget` bytes while
    respecting TPU (8, 128) block-alignment rules."""
    bytes_per_set = set_size * N_dims * itemsize
    b_fit = budget // max(bytes_per_set, 1)

    if b_fit >= batch:
        # Whole batch fits under budget.  For batch > 8 still split into >= 2 tiles so
        # v7x's two TensorCores both get work (harmless on v5e/v6e).
        if batch > 8:
            return max(8, ((batch // 2) // 8) * 8), set_size
        return batch, set_size

    if b_fit >= 8:
        return (b_fit // 8) * 8, set_size

    # Even 8 whole sets exceed the budget -> also tile the set dimension (reduction axis).
    # s_tile must exactly divide set_size (so the set-mean never touches padded garbage)
    # and be a multiple of 8 (sublane alignment).
    b_tile = batch if batch <= 8 else 8
    row_budget = max(1, budget // (b_tile * N_dims * itemsize))
    s_tile = set_size
    for s in range(8, set_size, 8):
        if set_size % s == 0 and s <= row_budget:
            s_tile = s  # largest fitting multiple-of-8 divisor
    if s_tile == set_size:
        # No divisor fits the budget: take the smallest multiple-of-8 divisor if any;
        # vmem_limit below is sized from the actual block either way.
        for s in range(8, set_size, 8):
            if set_size % s == 0:
                s_tile = s
                break
    return b_tile, s_tile


def kme_encoder(x, W, scale, *, b_tile=None, s_tile=None,
                x_block_budget_bytes=8 * 1024 * 1024):
    """KME forward pass.

    x:     (batch, set_size, *data_shape) float (f32 or bf16 streamed as-is)
    W:     (N_dims, d_half)               float
    scale: scalar (1/gamma)
    Returns (batch, 2*d_half) float32.
    """
    batch, set_size = x.shape[0], x.shape[1]
    N_dims, d_half = W.shape
    d = 2 * d_half

    # Free metadata reshape (collapses trailing data dims); keep the incoming dtype.
    x3 = jnp.reshape(x, (batch, set_size, -1))
    assert x3.shape[-1] == N_dims, "prod(data_shape) must match W.shape[0]"
    if np.dtype(x3.dtype) not in (np.dtype(jnp.float32), np.dtype(jnp.bfloat16)):
        x3 = x3.astype(jnp.float32)
    W = W.astype(jnp.float32)
    scale_arr = jnp.asarray(scale, jnp.float32).reshape(1)

    itemsize = np.dtype(x3.dtype).itemsize
    auto_b, auto_s = _choose_tiles(batch, set_size, N_dims, itemsize, x_block_budget_bytes)
    if b_tile is None:
        b_tile = auto_b
    if s_tile is None:
        s_tile = auto_s
    b_tile = min(b_tile, batch)
    s_tile = min(s_tile, set_size)
    if b_tile < batch:
        assert b_tile % 8 == 0, "b_tile must be a multiple of 8 (or equal batch)"
    if s_tile < set_size:
        assert s_tile % 8 == 0 and set_size % s_tile == 0, \
            "s_tile must be a multiple of 8 that divides set_size"

    # Ragged last batch tile is fine: OOB reads only feed output rows that are
    # never written back (each output row only uses its own set's rows).
    num_b = pl.cdiv(batch, b_tile)
    num_s = set_size // s_tile

    # VMEM sizing: double-buffered x / W blocks, resident output block, plus the
    # lane-padded (>=128-lane) f32 intermediates for xw / cos / sin.
    x_block_bytes = b_tile * s_tile * N_dims * itemsize
    w_bytes = N_dims * d_half * 4
    out_block_bytes = b_tile * d * 4
    inter_bytes = 4 * b_tile * s_tile * max(d_half, 128) * 4
    vmem_need = 2 * x_block_bytes + 2 * w_bytes + 2 * out_block_bytes + inter_bytes
    vmem_limit = int(min(max(vmem_need + (8 << 20), 32 << 20), 48 << 20))

    cost = pl.CostEstimate(
        flops=2 * batch * set_size * N_dims * d_half,
        transcendentals=2 * batch * set_size * d_half,
        bytes_accessed=batch * set_size * N_dims * itemsize + w_bytes + batch * d * 4,
    )

    kernel = functools.partial(_kme_kernel, d_half=d_half, set_size=set_size)

    out = pl.pallas_call(
        kernel,
        out_shape=jax.ShapeDtypeStruct((batch, d), jnp.float32),
        grid=(num_b, num_s),
        in_specs=[
            pl.BlockSpec(memory_space=pltpu.MemorySpace.SMEM),               # scale scalar
            pl.BlockSpec((b_tile, s_tile, N_dims), lambda i, j: (i, j, 0)),  # x tile
            pl.BlockSpec((N_dims, d_half), lambda i, j: (0, 0)),             # W, resident
        ],
        out_specs=pl.BlockSpec((b_tile, d), lambda i, j: (i, 0)),
        compiler_params=pltpu.CompilerParams(
            dimension_semantics=("parallel", "arbitrary"),
            vmem_limit_bytes=vmem_limit,
        ),
        cost_estimate=cost,
    )(scale_arr, x3, W)
    return out


def _reference(x, W, scale):
    # Pure-JAX reference of the module forward (scale commutes with the matmul).
    xf = x.reshape(x.shape[0], x.shape[1], -1).astype(jnp.float32)
    xw = scale * jnp.dot(xf, W.astype(jnp.float32),
                         precision=jax.lax.Precision.HIGHEST,
                         preferred_element_type=jnp.float32)
    return jnp.concatenate([jnp.cos(xw), jnp.sin(xw)], axis=-1).mean(axis=1)


if __name__ == "__main__":
    # Module hyper-params (mirroring KMEEncoder.__init__)
    data_shape = (4, 16, 16)           # per-set-element data shape -> N_dims = 1024
    gamma = 0.1
    d = 32
    d_half = d // 2
    N_dims = int(np.prod(data_shape))

    key = jax.random.PRNGKey(0)
    kx, kw, kx2, kx3 = jax.random.split(key, 4)
    # Deterministic synthetic parameters (W ~ randn, scale = 1/gamma), not a checkpoint.
    W = jax.random.normal(kw, (N_dims, d_half), dtype=jnp.float32)
    scale = 1.0 / gamma

    # Trig arguments have magnitude ~scale*sqrt(N_dims) (hundreds of radians), so f32-level
    # matmul rounding is amplified by range reduction; 1e-3 on values in [-1, 1] is meaningful.
    TOL = 1e-3

    # ---- check 1: small batch, single grid step ---------------------------------
    batch, set_size = 2, 8
    x = jax.random.normal(kx, (batch, set_size) + data_shape, dtype=jnp.float32)
    out = jax.block_until_ready(kme_encoder(x, W, scale))
    assert out.shape == (batch, d)
    np.testing.assert_allclose(np.asarray(out), np.asarray(_reference(x, W, scale)),
                               rtol=TOL, atol=TOL)

    # ---- check 2: multi-step batch grid with a ragged last tile (batch=12, b_tile=8) ----
    batch2 = 12
    x2 = jax.random.normal(kx2, (batch2, set_size) + data_shape, dtype=jnp.float32)
    out2 = jax.block_until_ready(kme_encoder(x2, W, scale, b_tile=8))
    assert out2.shape == (batch2, d)
    np.testing.assert_allclose(np.asarray(out2), np.asarray(_reference(x2, W, scale)),
                               rtol=TOL, atol=TOL)

    # ---- check 3: set-dimension reduction path (grid axis 1 > 1, accumulator) ----
    batch3, set_size3 = 4, 16
    x3 = jax.random.normal(kx3, (batch3, set_size3) + data_shape, dtype=jnp.float32)
    out3 = jax.block_until_ready(kme_encoder(x3, W, scale, b_tile=4, s_tile=8))
    assert out3.shape == (batch3, d)
    np.testing.assert_allclose(np.asarray(out3), np.asarray(_reference(x3, W, scale)),
                               rtol=TOL, atol=TOL)

    print("KERNEL_OK")
</pallas_src>

<mosaic_0001>
module attributes {stable_mosaic.version = 11 : i64} {
  func.func @_kme_kernel(%arg0: i32, %arg1: i32, %arg2: memref<1xf32, #tpu.memory_space<smem>>, %arg3: memref<2x8x1024xf32, #tpu.memory_space<vmem>>, %arg4: memref<1024x16xf32, #tpu.memory_space<vmem>>, %arg5: memref<2x32xf32, #tpu.memory_space<vmem>>) attributes {dimension_semantics = [#tpu.dimension_semantics<parallel>, #tpu.dimension_semantics<arbitrary>], iteration_bounds = array<i64: 1, 1>, scalar_prefetch = 0 : i64, scratch_operands = 0 : i64, tpu.core_type = #tpu.core_type<tc>, window_params = [{transform_indices = @transform_0, window_bounds = array<i64: 1>}, {transform_indices = @transform_1, window_bounds = array<i64: 2, 8, 1024>}, {pipeline_mode = #tpu.pipeline_mode<synchronous>, transform_indices = @transform_2, window_bounds = array<i64: 1024, 16>}, {transform_indices = @transform_3, window_bounds = array<i64: 2, 32>}]} {
    %c0_i32 = arith.constant 0 : i32
    %0 = arith.cmpi eq, %arg1, %c0_i32 : i32
    %1 = arith.extui %0 : i1 to i32
    %c0_i32_0 = arith.constant 0 : i32
    %2 = arith.cmpi ne, %1, %c0_i32_0 : i32
    scf.if %2 {
      %cst_17 = arith.constant 0.000000e+00 : f32
      %22 = vector.broadcast %cst_17 : f32 to vector<2x32xf32>
      %c0_18 = arith.constant 0 : index
      %c0_19 = arith.constant 0 : index
      %23 = vector.load %arg5[%c0_18, %c0_19] : memref<2x32xf32, #tpu.memory_space<vmem>>, vector<2x32xf32>
      tpu.vector_store %arg5[%c0_18, %c0_19], %22 {strides = array<i32>} : memref<2x32xf32, #tpu.memory_space<vmem>>, vector<2x32xf32>,
    } else {
    }
    %c0 = arith.constant 0 : index
    %3 = memref.load %arg2[%c0] : memref<1xf32, #tpu.memory_space<smem>>
    %c0_1 = arith.constant 0 : index
    %c0_2 = arith.constant 0 : index
    %c0_3 = arith.constant 0 : index
    %4 = vector.load %arg3[%c0_1, %c0_2, %c0_3] : memref<2x8x1024xf32, #tpu.memory_space<vmem>>, vector<2x8x1024xf32>
    %c0_4 = arith.constant 0 : index
    %c0_5 = arith.constant 0 : index
    %5 = vector.load %arg4[%c0_4, %c0_5] : memref<1024x16xf32, #tpu.memory_space<vmem>>, vector<1024x16xf32>
    "tpu.trace_start"() <{level = 10 : i32, message = "bsn,nd->bsd"}> : () -> ()
    %cst = arith.constant dense<0.000000e+00> : vector<2x8x16xf32>
    %6 = tpu.matmul %4, %5, %cst {dimension_numbers = #tpu.dot_dimension_numbers<[2], [0], [0, 1], [1], [0, 0, 0, 1, 1, 1], [], []>} : vector<2x8x1024xf32>, vector<1024x16xf32>, vector<2x8x16xf32> -> vector<2x8x16xf32>
    "tpu.trace_stop"() : () -> ()
    %7 = vector.broadcast %3 : f32 to vector<2x8x16xf32>
    %8 = arith.mulf %6, %7 : vector<2x8x16xf32>
    %c0_6 = arith.constant 0 : index
    %c0_7 = arith.constant 0 : index
    %9 = vector.load %arg5[%c0_6, %c0_7] : memref<2x32xf32, #tpu.memory_space<vmem>>, vector<2x16xf32>
    %10 = math.cos %8 : vector<2x8x16xf32>
    %cst_8 = arith.constant dense<0.000000e+00> : vector<2x16xf32>
    %11 = vector.multi_reduction <add>, %10, %cst_8 [1] : vector<2x8x16xf32> to vector<2x16xf32>
    %12 = arith.addf %9, %11 : vector<2x16xf32>
    %c0_9 = arith.constant 0 : index
    %c0_10 = arith.constant 0 : index
    %13 = vector.load %arg5[%c0_9, %c0_10] : memref<2x32xf32, #tpu.memory_space<vmem>>, vector<2x16xf32>
    tpu.vector_store %arg5[%c0_9, %c0_10], %12 {strides = array<i32>} : memref<2x32xf32, #tpu.memory_space<vmem>>, vector<2x16xf32>,
    %c0_11 = arith.constant 0 : index
    %c16 = arith.constant 16 : index
    %14 = vector.load %arg5[%c0_11, %c16] : memref<2x32xf32, #tpu.memory_space<vmem>>, vector<2x16xf32>
    %15 = math.sin %8 : vector<2x8x16xf32>
    %cst_12 = arith.constant dense<0.000000e+00> : vector<2x16xf32>
    %16 = vector.multi_reduction <add>, %15, %cst_12 [1] : vector<2x8x16xf32> to vector<2x16xf32>
    %17 = arith.addf %14, %16 : vector<2x16xf32>
    %c0_13 = arith.constant 0 : index
    %c16_14 = arith.constant 16 : index
    %18 = vector.load %arg5[%c0_13, %c16_14] : memref<2x32xf32, #tpu.memory_space<vmem>>, vector<2x16xf32>
    tpu.vector_store %arg5[%c0_13, %c16_14], %17 {strides = array<i32>} : memref<2x32xf32, #tpu.memory_space<vmem>>, vector<2x16xf32>,
    %c0_i32_15 = arith.constant 0 : i32
    %19 = arith.cmpi eq, %arg1, %c0_i32_15 : i32
    %20 = arith.extui %19 : i1 to i32
    %c0_i32_16 = arith.constant 0 : i32
    %21 = arith.cmpi ne, %20, %c0_i32_16 : i32
    scf.if %21 {
      %c0_17 = arith.constant 0 : index
      %c0_18 = arith.constant 0 : index
      %22 = vector.load %arg5[%c0_17, %c0_18] : memref<2x32xf32, #tpu.memory_space<vmem>>, vector<2x32xf32>
      %cst_19 = arith.constant 1.250000e-01 : f32
      %23 = vector.broadcast %cst_19 : f32 to vector<2x32xf32>
      %24 = arith.mulf %22, %23 : vector<2x32xf32>
      %c0_20 = arith.constant 0 : index
      %c0_21 = arith.constant 0 : index
      %25 = vector.load %arg5[%c0_20, %c0_21] : memref<2x32xf32, #tpu.memory_space<vmem>>, vector<2x32xf32>
      tpu.vector_store %arg5[%c0_20, %c0_21], %24 {strides = array<i32>} : memref<2x32xf32, #tpu.memory_space<vmem>>, vector<2x32xf32>,
    } else {
    }
    return
  }
  func.func @transform_0(%arg0: i32, %arg1: i32) -> i32 {
    %c0_i32 = arith.constant 0 : i32
    %c0_i32_0 = arith.constant 0 : i32
    return %c0_i32 : i32
  }
  func.func @transform_1(%arg0: i32, %arg1: i32) -> (i32, i32, i32) {
    %c0_i32 = arith.constant 0 : i32
    %c0_i32_0 = arith.constant 0 : i32
    return %arg0, %arg1, %c0_i32 : i32, i32, i32
  }
  func.func @transform_2(%arg0: i32, %arg1: i32) -> (i32, i32) {
    %c0_i32 = arith.constant 0 : i32
    %c0_i32_0 = arith.constant 0 : i32
    %c0_i32_1 = arith.constant 0 : i32
    return %c0_i32, %c0_i32_0 : i32, i32
  }
  func.func @transform_3(%arg0: i32, %arg1: i32) -> (i32, i32) {
    %c0_i32 = arith.constant 0 : i32
    %c0_i32_0 = arith.constant 0 : i32
    return %arg0, %c0_i32 : i32, i32
  }
}

</mosaic_0001>

<bundles_post_ra>
// kernel: tpu_custom_call.1
= control target key start
LH: loop header
LB: loop body
LE: loop exit
PB: predicated region body
PF: predicated region fallthrough
CT: control target
= control target key end

     0   :  { %s1840_s0 = inlined_call_operand.<no memory space> [shape: f32[1], index: 0, kind: input, shape index: {}]   ;;  %s1841_s1 = inlined_call_operand.vmem [shape: f32[2,8,1024], index: 1, kind: input, shape index: {}]   ;;  %s1842_s2 = inlined_call_operand.vmem [shape: f32[1024,16], index: 2, kind: input, shape index: {}]   ;;  %s1843_s3 = inlined_call_operand.hbm [shape: f32[2,32], index: 3, kind: output, shape index: {}]  }
   0x1   :  { %v55_v0 = vld [vmem:[%s1842_s2 + $0x80] sm:$0xff]  ;;  %v56_v1 = vld [vmem:[%s1842_s2 + $0x88] sm:$0xff]  ;;  %v57_v11 = vld [vmem:[%s1842_s2 + $0x90] sm:$0xff] }
   0x2   :  { %v87_v2 = vld [vmem:[%s1842_s2 + $0x180] sm:$0xff]  ;;  %v1121_v3 = vpack.c.bf16 %v56_v1, %v55_v0  ;;  %v88_v4 = vld [vmem:[%s1842_s2 + $0x188] sm:$0xff]  ;;  %v58_v13 = vld [vmem:[%s1842_s2 + $0x98] sm:$0xff] }
   0x3   :  { %v39_v5 = vld [vmem:[%s1842_s2] sm:$0xff]  ;;  %v40_v6 = vld [vmem:[%s1842_s2 + $0x8] sm:$0xff]  ;;  %v1153_v7 = vpack.c.bf16 %v88_v4, %v87_v2  ;;  %v89_v14 = vld [vmem:[%s1842_s2 + $0x190] sm:$0xff]  ;;  %v1125_v16 = vpack.c.bf16 %v58_v13, %v57_v11 }
   0x4   :  { %v1123_v8 = vpack.c.bf16 %v40_v6, %v39_v5  ;;  %v71_v9 = vld [vmem:[%s1842_s2 + $0x100] sm:$0xff]  ;;  %v72_v10 = vld [vmem:[%s1842_s2 + $0x108] sm:$0xff]  ;;  %1122 = vmatprep.subr.bf16.mxu0 %v1121_v3  ;;  %v90_v15 = vld [vmem:[%s1842_s2 + $0x198] sm:$0xff] }
   0x5   :  { %v1155_v12 = vpack.c.bf16 %v72_v10, %v71_v9  ;;  %1154 = vmatprep.subr.bf16.mxu1 %v1153_v7  ;;  %v1157_v17 = vpack.c.bf16 %v90_v15, %v89_v14  ;;  %v41_v18 = vld [vmem:[%s1842_s2 + $0x10] sm:$0xff]  ;;  %v42_v19 = vld [vmem:[%s1842_s2 + $0x18] sm:$0xff]  ;;  %v59_v23 = vld [vmem:[%s1842_s2 + $0xa0] sm:$0xff] }
   0x6   :  { %1124 = vmatpush3.bf16.msra.mxu0 %v1123_v8  ;;  %v73_v20 = vld [vmem:[%s1842_s2 + $0x110] sm:$0xff]  ;;  %v1127_v21 = vpack.c.bf16 %v42_v19, %v41_v18  ;;  %v74_v22 = vld [vmem:[%s1842_s2 + $0x118] sm:$0xff]  ;;  %v60_v24 = vld [vmem:[%s1842_s2 + $0xa8] sm:$0xff] }
   0x7   :  { %1156 = vmatpush3.bf16.msra.mxu1 %v1155_v12  ;;  %1126 = vmatprep.subr.bf16.mxu0 %v1125_v16  ;;  %v1159_v25 = vpack.c.bf16 %v74_v22, %v73_v20  ;;  %v1129_v26 = vpack.c.bf16 %v60_v24, %v59_v23  ;;  %v91_v27 = vld [vmem:[%s1842_s2 + $0x1a0] sm:$0xff]  ;;  %v92_v28 = vld [vmem:[%s1842_s2 + $0x1a8] sm:$0xff]  ;;  %v61_v35 = vld [vmem:[%s1842_s2 + $0xb0] sm:$0xff] }
   0x8   :  { %1158 = vmatprep.subr.bf16.mxu1 %v1157_v17  ;;  %v43_v29 = vld [vmem:[%s1842_s2 + $0x20] sm:$0xff]  ;;  %v1161_v30 = vpack.c.bf16 %v92_v28, %v91_v27  ;;  %v44_v31 = vld [vmem:[%s1842_s2 + $0x28] sm:$0xff]  ;;  %v62_v36 = vld [vmem:[%s1842_s2 + $0xb8] sm:$0xff] }
   0x9   :  { %v75_v32 = vld [vmem:[%s1842_s2 + $0x120] sm:$0xff]  ;;  %v76_v33 = vld [vmem:[%s1842_s2 + $0x128] sm:$0xff]  ;;  %v1131_v34 = vpack.c.bf16 %v44_v31, %v43_v29  ;;  %v93_v37 = vld [vmem:[%s1842_s2 + $0x1b0] sm:$0xff]  ;;  %v1133_v39 = vpack.c.bf16 %v62_v36, %v61_v35 }
   0xa   :  { %1128 = vmatpush3.bf16.msra.mxu0 %v1127_v21  ;;  %v1163_v38 = vpack.c.bf16 %v76_v33, %v75_v32  ;;  %v94_v40 = vld [vmem:[%s1842_s2 + $0x1b8] sm:$0xff]  ;;  %v45_v41 = vld [vmem:[%s1842_s2 + $0x30] sm:$0xff]  ;;  %v63_v46 = vld [vmem:[%s1842_s2 + $0xc0] sm:$0xff] }
   0xb   :  { %1160 = vmatpush3.bf16.msra.mxu1 %v1159_v25  ;;  %1130 = vmatprep.subr.bf16.mxu0 %v1129_v26  ;;  %v46_v42 = vld [vmem:[%s1842_s2 + $0x38] sm:$0xff]  ;;  %v1165_v43 = vpack.c.bf16 %v94_v40, %v93_v37  ;;  %v77_v44 = vld [vmem:[%s1842_s2 + $0x130] sm:$0xff]  ;;  %v64_v47 = vld [vmem:[%s1842_s2 + $0xc8] sm:$0xff] }
   0xc   :  { %1162 = vmatprep.subr.bf16.mxu1 %v1161_v30  ;;  %v78_v45 = vld [vmem:[%s1842_s2 + $0x138] sm:$0xff]  ;;  %v95_v48 = vld [vmem:[%s1842_s2 + $0x1c0] sm:$0xff]  ;;  %v96_v49 = vld [vmem:[%s1842_s2 + $0x1c8] sm:$0xff]  ;;  %v1135_v50 = vpack.c.bf16 %v46_v42, %v45_v41  ;;  %v1137_v52 = vpack.c.bf16 %v64_v47, %v63_v46 }
   0xd   :  { %v1167_v51 = vpack.c.bf16 %v78_v45, %v77_v44  ;;  %v47_v53 = vld [vmem:[%s1842_s2 + $0x40] sm:$0xff]  ;;  %v48_v54 = vld [vmem:[%s1842_s2 + $0x48] sm:$0xff]  ;;  %v1169_v56 = vpack.c.bf16 %v96_v49, %v95_v48  ;;  %v65_v58 = vld [vmem:[%s1842_s2 + $0xd0] sm:$0xff] }
   0xe   :  { %1132 = vmatpush3.bf16.msra.mxu0 %v1131_v34  ;;  %v79_v55 = vld [vmem:[%s1842_s2 + $0x140] sm:$0xff]  ;;  %v80_v57 = vld [vmem:[%s1842_s2 + $0x148] sm:$0xff]  ;;  %v66_v59 = vld [vmem:[%s1842_s2 + $0xd8] sm:$0xff]  ;;  %v1139_v62 = vpack.c.bf16 %v48_v54, %v47_v53 }
   0xf   :  { %1164 = vmatpush3.bf16.msra.mxu1 %v1163_v38  ;;  %1134 = vmatprep.subr.bf16.mxu0 %v1133_v39  ;;  %v97_v60 = vld [vmem:[%s1842_s2 + $0x1d0] sm:$0xff]  ;;  %v98_v61 = vld [vmem:[%s1842_s2 + $0x1d8] sm:$0xff]  ;;  %v1171_v63 = vpack.c.bf16 %v80_v57, %v79_v55  ;;  %v1141_v0 = vpack.c.bf16 %v66_v59, %v65_v58  ;;  %v67_v6 = vld [vmem:[%s1842_s2 + $0xe0] sm:$0xff] }
  0x10   :  { %1166 = vmatprep.subr.bf16.mxu1 %v1165_v43  ;;  %v49_v1 = vld [vmem:[%s1842_s2 + $0x50] sm:$0xff]  ;;  %v50_v2 = vld [vmem:[%s1842_s2 + $0x58] sm:$0xff]  ;;  %v1173_v4 = vpack.c.bf16 %v98_v61, %v97_v60  ;;  %v68_v7 = vld [vmem:[%s1842_s2 + $0xe8] sm:$0xff] }
  0x11   :  { %v81_v3 = vld [vmem:[%s1842_s2 + $0x150] sm:$0xff]  ;;  %v82_v5 = vld [vmem:[%s1842_s2 + $0x158] sm:$0xff]  ;;  %v99_v8 = vld [vmem:[%s1842_s2 + $0x1e0] sm:$0xff]  ;;  %v1143_v10 = vpack.c.bf16 %v50_v2, %v49_v1  ;;  %v1145_v14 = vpack.c.bf16 %v68_v7, %v67_v6 }
  0x12   :  { %1136 = vmatpush3.bf16.msra.mxu0 %v1135_v50  ;;  %v100_v9 = vld [vmem:[%s1842_s2 + $0x1e8] sm:$0xff]  ;;  %v51_v11 = vld [vmem:[%s1842_s2 + $0x60] sm:$0xff]  ;;  %v1175_v13 = vpack.c.bf16 %v82_v5, %v81_v3  ;;  %v26_v17 = vld [vmem:[%s1841_s1 + $0x18] sm:$0xff] }
  0x13   :  { %1168 = vmatpush3.bf16.msra.mxu1 %v1167_v51  ;;  %1138 = vmatprep.subr.bf16.mxu0 %v1137_v52  ;;  %v52_v12 = vld [vmem:[%s1842_s2 + $0x68] sm:$0xff]  ;;  %v83_v15 = vld [vmem:[%s1842_s2 + $0x160] sm:$0xff]  ;;  %v1177_v18 = vpack.c.bf16 %v100_v9, %v99_v8  ;;  %v69_v20 = vld [vmem:[%s1842_s2 + $0xf0] sm:$0xff] }
  0x14   :  { %1170 = vmatprep.subr.bf16.mxu1 %v1169_v56  ;;  %v24_v16 = vld [vmem:[%s1841_s1 + $0x8] sm:$0xff]  ;;  %v70_v21 = vld [vmem:[%s1842_s2 + $0xf8] sm:$0xff]  ;;  %v101_v22 = vld [vmem:[%s1842_s2 + $0x1f0] sm:$0xff]  ;;  %306 = vmatprep.mubr.f32.mxu1 %v26_v17  ;;  %v1147_v24 = vpack.c.bf16 %v52_v12, %v51_v11 }
  0x15   :  { %v84_v19 = vld [vmem:[%s1842_s2 + $0x168] sm:$0xff]  ;;  %231 = vmatprep.mubr.f32.mxu0 %v24_v16  ;;  %v102_v23 = vld [vmem:[%s1842_s2 + $0x1f8] sm:$0xff]  ;;  %v1149_v26 = vpack.c.bf16 %v70_v21, %v69_v20  ;;  %v53_v27 = vld [vmem:[%s1842_s2 + $0x70] sm:$0xff] }
  0x16   :  { %1140 = vmatpush3.bf16.msra.mxu0 %v1139_v62  ;;  %v1179_v25 = vpack.c.bf16 %v84_v19, %v83_v15  ;;  %v54_v28 = vld [vmem:[%s1842_s2 + $0x78] sm:$0xff]  ;;  %v85_v29 = vld [vmem:[%s1842_s2 + $0x170] sm:$0xff]  ;;  %v1181_v30 = vpack.c.bf16 %v102_v23, %v101_v22  ;;  %v119_v32 = vld [vmem:[%s1842_s2 + $0x280] sm:$0xff] }
  0x17   :  { %1172 = vmatpush3.bf16.msra.mxu1 %v1171_v63  ;;  %1142 = vmatprep.subr.bf16.mxu0 %v1141_v0  ;;  %v86_v31 = vld [vmem:[%s1842_s2 + $0x178] sm:$0xff]  ;;  %v120_v33 = vld [vmem:[%s1842_s2 + $0x288] sm:$0xff]  ;;  %v151_v34 = vld [vmem:[%s1842_s2 + $0x380] sm:$0xff]  ;;  %v1151_v36 = vpack.c.bf16 %v54_v28, %v53_v27 }
  0x18   :  { %1174 = vmatprep.subr.bf16.mxu1 %v1173_v4  ;;  %v152_v35 = vld [vmem:[%s1842_s2 + $0x388] sm:$0xff]  ;;  %v1183_v37 = vpack.c.bf16 %v86_v31, %v85_v29  ;;  %v1185_v38 = vpack.c.bf16 %v120_v33, %v119_v32  ;;  %v103_v39 = vld [vmem:[%s1842_s2 + $0x200] sm:$0xff]  ;;  %v121_v44 = vld [vmem:[%s1842_s2 + $0x290] sm:$0xff] }
  0x19   :  { %v104_v40 = vld [vmem:[%s1842_s2 + $0x208] sm:$0xff]  ;;  %v135_v41 = vld [vmem:[%s1842_s2 + $0x300] sm:$0xff]  ;;  %v1217_v42 = vpack.c.bf16 %v152_v35, %v151_v34  ;;  %v122_v45 = vld [vmem:[%s1842_s2 + $0x298] sm:$0xff] }
  0x1a   :  { %1144 = vmatpush3.bf16.msra.mxu0 %v1143_v10  ;;  %v136_v43 = vld [vmem:[%s1842_s2 + $0x308] sm:$0xff]  ;;  %v153_v46 = vld [vmem:[%s1842_s2 + $0x390] sm:$0xff]  ;;  %v154_v47 = vld [vmem:[%s1842_s2 + $0x398] sm:$0xff]  ;;  %v1187_v50 = vpack.c.bf16 %v104_v40, %v103_v39  ;;  %v1189_v52 = vpack.c.bf16 %v122_v45, %v121_v44 }
  0x1b   :  { %1176 = vmatpush3.bf16.msra.mxu1 %v1175_v13  ;;  %1146 = vmatprep.subr.bf16.mxu0 %v1145_v14  ;;  %v23_v48 = vld [vmem:[%s1841_s1] sm:$0xff]  ;;  %v25_v49 = vld [vmem:[%s1841_s1 + $0x10] sm:$0xff]  ;;  %v1219_v51 = vpack.c.bf16 %v136_v43, %v135_v41  ;;  %v106_v54 = vld [vmem:[%s1842_s2 + $0x218] sm:$0xff]  ;;  %v1221_v56 = vpack.c.bf16 %v154_v47, %v153_v46 }
  0x1c   :  { %1178 = vmatprep.subr.bf16.mxu1 %v1177_v18  ;;  %v105_v53 = vld [vmem:[%s1842_s2 + $0x210] sm:$0xff]  ;;  %v138_v57 = vld [vmem:[%s1842_s2 + $0x318] sm:$0xff]  ;;  %v123_v58 = vld [vmem:[%s1842_s2 + $0x2a0] sm:$0xff] }
  0x1d   :  { %v137_v55 = vld [vmem:[%s1842_s2 + $0x310] sm:$0xff]  ;;  %v124_v59 = vld [vmem:[%s1842_s2 + $0x2a8] sm:$0xff]  ;;  %v155_v60 = vld [vmem:[%s1842_s2 + $0x3a0] sm:$0xff]  ;;  %v1191_v62 = vpack.c.bf16 %v106_v54, %v105_v53 }
  0x1e   :  { %1148 = vmatpush3.bf16.msra.mxu0 %v1147_v24  ;;  %v156_v61 = vld [vmem:[%s1842_s2 + $0x3a8] sm:$0xff]  ;;  %v1223_v63 = vpack.c.bf16 %v138_v57, %v137_v55  ;;  %v1193_v0 = vpack.c.bf16 %v124_v59, %v123_v58  ;;  %v107_v1 = vld [vmem:[%s1842_s2 + $0x220] sm:$0xff]  ;;  %v125_v6 = vld [vmem:[%s1842_s2 + $0x2b0] sm:$0xff] }
  0x1f   :  { %1180 = vmatpush3.bf16.msra.mxu1 %v1179_v25  ;;  %1150 = vmatprep.subr.bf16.mxu0 %v1149_v26  ;;  %v108_v2 = vld [vmem:[%s1842_s2 + $0x228] sm:$0xff]  ;;  %v139_v3 = vld [vmem:[%s1842_s2 + $0x320] sm:$0xff]  ;;  %v1225_v4 = vpack.c.bf16 %v156_v61, %v155_v60  ;;  %v126_v7 = vld [vmem:[%s1842_s2 + $0x2b8] sm:$0xff] }
  0x20   :  { %1182 = vmatprep.subr.bf16.mxu1 %v1181_v30  ;;  %v140_v5 = vld [vmem:[%s1842_s2 + $0x328] sm:$0xff]  ;;  %v109_v8 = vld [vmem:[%s1842_s2 + $0x230] sm:$0xff]  ;;  %v158_v10 = vld [vmem:[%s1842_s2 + $0x3b8] sm:$0xff]  ;;  %v1195_v11 = vpack.c.bf16 %v108_v2, %v107_v1  ;;  %v1197_v16 = vpack.c.bf16 %v126_v7, %v125_v6 }
  0x21   :  { %v157_v9 = vld [vmem:[%s1842_s2 + $0x3b0] sm:$0xff]  ;;  %v110_v12 = vld [vmem:[%s1842_s2 + $0x238] sm:$0xff]  ;;  %v32_v14 = vld [vmem:[%s1841_s1 + $0x48] sm:$0xff]  ;;  %v1227_v15 = vpack.c.bf16 %v140_v5, %v139_v3 }
  0x22   :  { %1152 = vmatpush3.bf16.msra.mxu0 %v1151_v36  ;;  %v141_v13 = vld [vmem:[%s1842_s2 + $0x330] sm:$0xff]  ;;  %v142_v17 = vld [vmem:[%s1842_s2 + $0x338] sm:$0xff]  ;;  %v127_v18 = vld [vmem:[%s1842_s2 + $0x2c0] sm:$0xff]  ;;  %v1229_v20 = vpack.c.bf16 %v158_v10, %v157_v9  ;;  %v1199_v26 = vpack.c.bf16 %v110_v12, %v109_v8 }
  0x23   :  { %1184 = vmatpush3.bf16.msra.mxu1 %v1183_v37  ;;  %1186 = vmatprep.subr.bf16.mxu0 %v1185_v38  ;;  %v34_v19 = vld [vmem:[%s1841_s1 + $0x58] sm:$0xff]  ;;  %v128_v21 = vld [vmem:[%s1842_s2 + $0x2c8] sm:$0xff]  ;;  %v31_v22 = vld [vmem:[%s1841_s1 + $0x40] sm:$0xff]  ;;  %v1231_v29 = vpack.c.bf16 %v142_v17, %v141_v13 }
  0x24   :  { %1218 = vmatprep.subr.bf16.mxu1 %v1217_v42  ;;  %v33_v23 = vld [vmem:[%s1841_s1 + $0x50] sm:$0xff]  ;;  %v159_v24 = vld [vmem:[%s1842_s2 + $0x3c0] sm:$0xff]  ;;  %v160_v25 = vld [vmem:[%s1842_s2 + $0x3c8] sm:$0xff]  ;;  %v1201_v30 = vpack.c.bf16 %v128_v21, %v127_v18 }
  0x25   :  { %232 = vmatmul.mubr.f32.vlgmr.msra.gmra.mrb[0].mxu0 %v23_v48  ;;  %v111_v27 = vld [vmem:[%s1842_s2 + $0x240] sm:$0xff]  ;;  %v112_v28 = vld [vmem:[%s1842_s2 + $0x248] sm:$0xff]  ;;  %v1233_v34 = vpack.c.bf16 %v160_v25, %v159_v24  ;;  %v129_v35 = vld [vmem:[%s1842_s2 + $0x2d0] sm:$0xff] }
  0x26   :  { %307 = vmatmul.mubr.f32.vlgmr.msra.gmra.mrb[0].mxu1 %v25_v49  ;;  %1188 = vmatpush3.bf16.msra.mxu0 %v1187_v50  ;;  %v143_v31 = vld [vmem:[%s1842_s2 + $0x340] sm:$0xff]  ;;  %v144_v32 = vld [vmem:[%s1842_s2 + $0x348] sm:$0xff]  ;;  %v130_v36 = vld [vmem:[%s1842_s2 + $0x2d8] sm:$0xff]  ;;  %v1203_v40 = vpack.c.bf16 %v112_v28, %v111_v27 }
  0x27   :  { %1220 = vmatpush3.bf16.msra.mxu1 %v1219_v51  ;;  %1190 = vmatprep.subr.bf16.mxu0 %v1189_v52  ;;  %v28_v33 = vld [vmem:[%s1841_s1 + $0x28] sm:$0xff]  ;;  %v30_v37 = vld [vmem:[%s1841_s1 + $0x38] sm:$0xff]  ;;  %v161_v38 = vld [vmem:[%s1842_s2 + $0x3d0] sm:$0xff] }
  0x28   :  { %1222 = vmatprep.subr.bf16.mxu1 %v1221_v56  ;;  %236 = vmatprep.mubr.f32.mxu0 %v32_v14  ;;  %v162_v39 = vld [vmem:[%s1842_s2 + $0x3d8] sm:$0xff] }
  0x29   :  { %311 = vmatprep.mubr.f32.mxu1 %v34_v19  ;;  %237 = vmatmul.mubr.f32.gmra.mrb[2].mxu0 %v31_v22 }
  0x2a   :  { %1192 = vmatpush3.bf16.msra.mxu0 %v1191_v62  ;;  %312 = vmatmul.mubr.f32.gmra.mrb[2].mxu1 %v33_v23 }
  0x2b   :  { %1224 = vmatpush3.bf16.msra.mxu1 %v1223_v63  ;;  %1194 = vmatprep.subr.bf16.mxu0 %v1193_v0 }
  0x2c   :  { %1226 = vmatprep.subr.bf16.mxu1 %v1225_v4  ;;  %381 = vmatprep.mubr.f32.mxu0 %v28_v33 }
  0x2d   :  { %456 = vmatprep.mubr.f32.mxu1 %v30_v37 }
  0x2e   :  { %1196 = vmatpush3.bf16.msra.mxu0 %v1195_v11 }
  0x2f   :  { %1228 = vmatpush3.bf16.msra.mxu1 %v1227_v15  ;;  %1198 = vmatprep.subr.bf16.mxu0 %v1197_v16 }
  0x30   :  { %1230 = vmatprep.subr.bf16.mxu1 %v1229_v20 }
  0x32   :  { %1200 = vmatpush3.bf16.msra.mxu0 %v1199_v26 }
  0x33   :  { %9 = vsyncpa [#allocation4], 0  ;;  %1232 = vmatpush3.bf16.msra.mxu1 %v1231_v29  ;;  %1202 = vmatprep.subr.bf16.mxu0 %v1201_v30  ;;  %v1235_v41 = vpack.c.bf16 %v144_v32, %v143_v31  ;;  %v1205_v42 = vpack.c.bf16 %v130_v36, %v129_v35  ;;  %v113_v43 = vld [vmem:[%s1842_s2 + $0x250] sm:$0xff]  ;;  %v114_v44 = vld [vmem:[%s1842_s2 + $0x258] sm:$0xff]  ;;  %v1237_v46 = vpack.c.bf16 %v162_v39, %v161_v38  ;;  %vm20_vm0 = vcmask 254976   ;;  %s1306_s30 = smov [#allocation3]  }
  0x34   :  { %v145_v45 = vld [vmem:[%s1842_s2 + $0x350] sm:$0xff]  ;;  %1234 = vmatprep.subr.bf16.mxu1 %v1233_v34  ;;  %v146_v47 = vld [vmem:[%s1842_s2 + $0x358] sm:$0xff]  ;;  %v131_v48 = vld [vmem:[%s1842_s2 + $0x2e0] sm:$0xff]  ;;  %v1207_v52 = vpack.c.bf16 %v114_v44, %v113_v43  ;;  %v1298_v16 = vmov 0.0   ;;  %v467_v39 = vstv %s1840_s0  ;;  %s1305_s0 = smov 16   ;;  %s945_s4 = sshll.u32 %s1306_s30, 4  ;;  %s946_s4 = int_to_ptr.vmem [resolvable:$true] %s945_s4 }
  0x35   :  { %v132_v49 = vld [vmem:[%s1842_s2 + $0x2e8] sm:$0xff]  ;;  %v163_v50 = vld [vmem:[%s1842_s2 + $0x3e0] sm:$0xff]  ;;  %v1239_v53 = vpack.c.bf16 %v146_v47, %v145_v45  ;;  %v133_v60 = vld [vmem:[%s1842_s2 + $0x2f0] sm:$0xff]  ;;  %21 = vst.msk [vmem:[#allocation3] sm:$0x3] %vm20_vm0, %v1298_v16  ;;  %s1274_s5 = scalar_lea.vmem %s946_s4, 32  ;;  %p1279_p1 = scmp.lt.s32.totalorder %s946_s4, %s946_s4 }
  0x36   :  { %v164_v51 = vld [vmem:[%s1842_s2 + $0x3e8] sm:$0xff]  ;;  %1204 = vmatpush3.bf16.msra.mxu0 %v1203_v40  ;;  %v1209_v54 = vpack.c.bf16 %v132_v49, %v131_v48  ;;  %v115_v55 = vld [vmem:[%s1842_s2 + $0x260] sm:$0xff]  ;;  %v134_v61 = vld [vmem:[%s1842_s2 + $0x2f8] sm:$0xff]  ;;  %p1275_p0 = scmp.ne.s32.totalorder %s946_s4, %s1274_s5  ;;  %p1280_p2 = scmp.lt.s32.totalorder %s1274_s5, %s1274_s5 }
  0x37   :  { %1236 = vmatpush3.bf16.msra.mxu1 %v1235_v41  ;;  %1206 = vmatprep.subr.bf16.mxu0 %v1205_v42  ;;  %v116_v56 = vld [vmem:[%s1842_s2 + $0x268] sm:$0xff]  ;;  %v147_v57 = vld [vmem:[%s1842_s2 + $0x360] sm:$0xff]  ;;  %v1241_v58 = vpack.c.bf16 %v164_v51, %v163_v50  ;;  %v165_v62 = vld [vmem:[%s1842_s2 + $0x3f0] sm:$0xff]  ;;  %v1213_v2 = vpack.c.bf16 %v134_v61, %v133_v60 }
  0x38   :  { %1238 = vmatprep.subr.bf16.mxu1 %v1237_v46  ;;  %v148_v59 = vld [vmem:[%s1842_s2 + $0x368] sm:$0xff]  ;;  %v166_v63 = vld [vmem:[%s1842_s2 + $0x3f8] sm:$0xff]  ;;  %v1211_v0 = vpack.c.bf16 %v116_v56, %v115_v55  ;;  %v117_v3 = vld [vmem:[%s1842_s2 + $0x270] sm:$0xff]  ;;  %p1281_p3 = por %p1280_p2, %p1279_p1 }
  0x39   :  { %v1243_v1 = vpack.c.bf16 %v148_v59, %v147_v57  ;;  %v118_v4 = vld [vmem:[%s1842_s2 + $0x278] sm:$0xff]  ;;  %v1245_v5 = vpack.c.bf16 %v166_v63, %v165_v62  ;;  %v149_v6 = vld [vmem:[%s1842_s2 + $0x370] sm:$0xff]  ;;  %v27_v10 = vld [vmem:[%s1841_s1 + $0x20] sm:$0xff] }
  0x3a   :  { %1208 = vmatpush3.bf16.msra.mxu0 %v1207_v52  ;;  %v150_v7 = vld [vmem:[%s1842_s2 + $0x378] sm:$0xff]  ;;  %v1215_v8 = vpack.c.bf16 %v118_v4, %v117_v3  ;;  %v29_v11 = vld [vmem:[%s1841_s1 + $0x30] sm:$0xff]  ;;  %v36_v12 = vld [vmem:[%s1841_s1 + $0x68] sm:$0xff]  ;;  %p1282_p4 = pnand %p1281_p3, %p1275_p0 }
  0x3b   :  { %1240 = vmatpush3.bf16.msra.mxu1 %v1239_v53  ;;  %1210 = vmatprep.subr.bf16.mxu0 %v1209_v54  ;;  %v1247_v9 = vpack.c.bf16 %v150_v7, %v149_v6  ;;  %v38_v13 = vld [vmem:[%s1841_s1 + $0x78] sm:$0xff]  ;;  %v35_v14 = vld [vmem:[%s1841_s1 + $0x60] sm:$0xff]  ;;  %v37_v15 = vld [vmem:[%s1841_s1 + $0x70] sm:$0xff]  ;;  %v1300_v6 = vmov 2475754826  }
  0x3c   :  { %1242 = vmatprep.subr.bf16.mxu1 %v1241_v58 }
  0x3e   :  { %1212 = vmatpush3.bf16.msra.mxu0 %v1211_v0 }
  0x3f   :  { %1244 = vmatpush3.bf16.msra.mxu1 %v1243_v1  ;;  %1214 = vmatprep.subr.bf16.mxu0 %v1213_v2  ;;  %v1299_v2 = vmov 683565275  }
  0x40   :  { %1246 = vmatprep.subr.bf16.mxu1 %v1245_v5 }
  0x42   :  { %1216 = vmatpush3.bf16.msra.mxu0 %v1215_v8  ;;  %v1301_v8 = vmov 2131351028  }
  0x43   :  { %1248 = vmatpush3.bf16.msra.mxu1 %v1247_v9 }
  0x45   :  { %382 = vmatmul.mubr.f32.vlgmr.msra.gmra.mrb[4].mxu0 %v27_v10  ;;  %v1302_v10 = vmov 2102212464  }
  0x46   :  { %457 = vmatmul.mubr.f32.vlgmr.msra.gmra.mrb[4].mxu1 %v29_v11  ;;  %386 = vmatprep.mubr.f32.mxu0 %v36_v12  ;;  %v1303_v12 = vmov 920167782  }
  0x47   :  { %461 = vmatprep.mubr.f32.mxu1 %v38_v13 }
  0x49   :  { %387 = vmatmul.mubr.f32.gmra.mrb[6].mxu0 %v35_v14 }
  0x4a   :  { %462 = vmatmul.mubr.f32.gmra.mrb[6].mxu1 %v37_v15 }
  0xf8   :  { %v1001_v17 = vpop.f32.mrb[0].mxu0 }
  0xf9   :  { %v1039_v18 = vpop.f32.mrb[0].mxu1  ;;  %v1002_v19 = vpop.f32.mrb[1].mxu0 }
  0xfa   :  { %v1003_v20 = vadd.f32 %v1002_v19, %v1001_v17  ;;  %v1040_v21 = vpop.f32.mrb[1].mxu1  ;;  %v1304_v19 = vmov 1326507024  }
  0xfb   :  { %v1041_v22 = vadd.f32 %v1040_v21, %v1039_v18 }
  0xfc   :  { %v1004_v24 = vpop.f32.mrb[2].mxu0 }
  0xfd   :  { %v309_v23 = vadd.f32 %v1041_v22, %v1003_v20  ;;  %v1042_v25 = vpop.f32.mrb[2].mxu1  ;;  %v1005_v26 = vpop.f32.mrb[3].mxu0 }
  0xfe   :  { %v1006_v27 = vadd.f32 %v1005_v26, %v1004_v24  ;;  %v1043_v28 = vpop.f32.mrb[3].mxu1 }
  0xff   :  { %v1044_v29 = vadd.f32 %v1043_v28, %v1042_v25 }
 0x101   :  { %v314_v30 = vadd.f32 %v1044_v29, %v1006_v27 }
 0x118   :  { %v1077_v31 = vpop.f32.mrb[4].mxu0 }
 0x119   :  { %v1078_v32 = vpop.f32.mrb[5].mxu0  ;;  %v1115_v33 = vpop.f32.mrb[4].mxu1 }
 0x11a   :  { %v1079_v34 = vadd.f32 %v1078_v32, %v1077_v31  ;;  %v1116_v35 = vpop.f32.mrb[5].mxu1 }
 0x11b   :  { %v1117_v36 = vadd.f32 %v1116_v35, %v1115_v33 }
 0x11c   :  { %v384_v37 = vadd.f32 %v1079_v34, %v309_v23  ;;  %v1080_v38 = vpop.f32.mrb[6].mxu0 }
 0x11d   :  { %v1081_v40 = vpop.f32.mrb[7].mxu0  ;;  %v1118_v41 = vpop.f32.mrb[6].mxu1 }
 0x11e   :  { %v459_v42 = vadd.f32 %v1117_v36, %v384_v37  ;;  %v1082_v43 = vadd.f32 %v1081_v40, %v1080_v38  ;;  %v1119_v44 = vpop.f32.mrb[7].mxu1 }
 0x11f   :  { %v1120_v45 = vadd.f32 %v1119_v44, %v1118_v41 }
 0x120   :  { %v1763_v46 = vmul.f32 %v467_v39, %v459_v42  ;;  %v389_v47 = vadd.f32 %v1082_v43, %v314_v30 }
 0x122   :  { %v471_v48 = vand.u32 2147483647, %v1763_v46  ;;  %v474_v49 = vand.u32 2139095040, %v1763_v46  ;;  %v464_v50 = vadd.f32 %v1120_v45, %v389_v47  ;;  %vm473_vm15 = vcmp.lt.s32.totalorder %v1763_v46, 0 }
 0x124   :  { %v475_v51 = vshrl.u32 %v474_v49, 23  ;;  %v1767_v52 = vmul.f32 %v467_v39, %v464_v50  ;;  %v478_v53 = vand.u32 8388607, %v471_v48 }
 0x126   :  { %v953_v54 = vadd.s32 4294967169, %v475_v51  ;;  %v577_v55 = vand.u32 2139095040, %v1767_v52  ;;  %v479_v57 = vor.u32 8388608, %v478_v53  ;;  %v574_v59 = vand.u32 2147483647, %v1767_v52 }
 0x128   :  { %v481_v56 = vadd.s32 1, %v953_v54  ;;  %v578_v58 = vshrl.u32 %v577_v55, 23  ;;  %v1773_v0 = vshll.u32 %v479_v57, 8  ;;  %v581_v4 = vand.u32 8388607, %v574_v59 }
 0x12a   :  { %vm482_vm1 = vcmp.gt.s32.totalorder %v481_v56, 0  ;;  %v957_v61 = vadd.s32 4294967169, %v578_v58  ;;  %v582_v34 = vor.u32 8388608, %v581_v4 }
 0x12b   :  { %v483_v60 = vsel %vm482_vm1, %v481_v56, 0  ;;  %vm472_vm1 = vcmp.le.f32.partialorder %v471_v48, 0.7853982 }
 0x12c   :  { %v484_v62 = vshrl.u32 %v483_v60, 5  ;;  %v485_v63 = vand.u32 31, %v483_v60  ;;  %v584_v5 = vadd.s32 1, %v957_v61  ;;  %v622_v49 = vshll.u32 %v582_v34, 8 }
 0x12e   :  { %v486_v1 = vsub.s32 32, %v485_v63  ;;  %v488_v3 = vshll.u32 %v1299_v2, %v485_v63  ;;  %v491_v7 = vshll.u32 %v1300_v6, %v485_v63  ;;  %v494_v9 = vshll.u32 %v1301_v8, %v485_v63 }
 0x12f   :  { %v497_v11 = vshll.u32 %v1302_v10, %v485_v63  ;;  %v500_v13 = vshll.u32 %v1303_v12, %v485_v63  ;;  %vm503_vm2 = vcmp.lt.s32.totalorder %v484_v62, 1  ;;  %vm505_vm3 = vcmp.lt.s32.totalorder %v484_v62, 3 }
 0x130   :  { %v489_v14 = vshrl.u32 %v1300_v6, %v486_v1  ;;  %v492_v15 = vshrl.u32 %v1301_v8, %v486_v1  ;;  %v495_v16 = vshrl.u32 %v1302_v10, %v486_v1  ;;  %v487_v17 = vshrl.u32 %v1299_v2, %v486_v1 }
 0x131   :  { %v498_v18 = vshrl.u32 %v1303_v12, %v486_v1  ;;  %v501_v20 = vshrl.u32 %v1304_v19, %v486_v1  ;;  %vm585_vm4 = vcmp.gt.s32.totalorder %v584_v5, 0  ;;  %vm506_vm5 = vcmp.lt.s32.totalorder %v484_v62, 4 }
 0x132   :  { %v490_v21 = vor.u32 %v489_v14, %v488_v3  ;;  %v493_v22 = vor.u32 %v492_v15, %v491_v7  ;;  %v496_v23 = vor.u32 %v495_v16, %v494_v9  ;;  %v586_v26 = vsel %vm585_vm4, %v584_v5, 0 }
 0x133   :  { %v499_v24 = vor.u32 %v498_v18, %v497_v11  ;;  %v502_v25 = vor.u32 %v501_v20, %v500_v13  ;;  %vm504_vm6 = vcmp.lt.s32.totalorder %v484_v62, 2  ;;  %v588_v37 = vand.u32 31, %v586_v26 }
 0x134   :  { %v507_v27 = vsel %vm503_vm2, %v487_v17, %v490_v21  ;;  %v508_v28 = vsel %vm506_vm5, %v496_v23, 2102212464  ;;  %v511_v29 = vsel %vm503_vm2, %v490_v21, %v493_v22  ;;  %v515_v30 = vsel %vm503_vm2, %v493_v22, %v496_v23 }
 0x135   :  { %v509_v31 = vsel %vm505_vm3, %v493_v22, %v508_v28  ;;  %v512_v32 = vsel %vm506_vm5, %v499_v24, 920167782  ;;  %v516_v33 = vsel %vm506_vm5, %v502_v25, 1326507024  ;;  %v587_v45 = vshrl.u32 %v586_v26, 5 }
 0x136   :  { %v513_v35 = vsel %vm505_vm3, %v496_v23, %v512_v32  ;;  %v517_v36 = vsel %vm505_vm3, %v499_v24, %v516_v33  ;;  %v510_v38 = vsel %vm504_vm6, %v507_v27, %v509_v31  ;;  %v589_v47 = vsub.s32 32, %v588_v37 }
 0x137   :  { %v514_v39 = vsel %vm504_vm6, %v511_v29, %v513_v35  ;;  %v518_v40 = vsel %vm504_vm6, %v515_v30, %v517_v36  ;;  %v526_v50 = vmul.u32 %v1773_v0, %v510_v38  ;;  %v591_v51 = vshll.u32 %v1299_v2, %v588_v37 }
 0x138   :  { %v1786_v41 = vmul.u32.u64.low %v1773_v0, %v518_v40  ;;  %v1787_v42 = vmul.u32.u64.high %v1773_v0, %v518_v40, %v1786_v41  ;;  %v1790_v43 = vmul.u32.u64.low %v1773_v0, %v514_v39  ;;  %v1791_v44 = vmul.u32.u64.high %v1773_v0, %v514_v39, %v1790_v43 }
 0x139   :  { %v594_v53 = vshll.u32 %v1300_v6, %v588_v37  ;;  %v597_v54 = vshll.u32 %v1301_v8, %v588_v37  ;;  %v592_v55 = vshrl.u32 %v1300_v6, %v589_v47  ;;  %v595_v56 = vshrl.u32 %v1301_v8, %v589_v47 }
 0x13a   :  { %v598_v57 = vshrl.u32 %v1302_v10, %v589_v47  ;;  %v600_v58 = vshll.u32 %v1302_v10, %v588_v37  ;;  %vm528_vm7 = vc.u32 %v1787_v42, %v1790_v43  ;;  %v529_v60 = vadd.s32 1, %v1791_v44 }
 0x13b   :  { %v601_v61 = vshrl.u32 %v1303_v12, %v589_v47  ;;  %v603_v62 = vshll.u32 %v1303_v12, %v588_v37  ;;  %v593_v63 = vor.u32 %v592_v55, %v591_v51  ;;  %v596_v1 = vor.u32 %v595_v56, %v594_v53 }
 0x13c   :  { %v599_v3 = vor.u32 %v598_v57, %v597_v54  ;;  %v604_v4 = vshrl.u32 %v1304_v19, %v589_v47  ;;  %v530_v0 = vsel %vm528_vm7, %v529_v60, %v1791_v44  ;;  %vm606_vm8 = vcmp.lt.s32.totalorder %v587_v45, 1 }
 0x13d   :  { %v602_v5 = vor.u32 %v601_v61, %v600_v58  ;;  %vm609_vm9 = vcmp.lt.s32.totalorder %v587_v45, 4  ;;  %v531_v6 = vadd.s32 %v530_v0, %v526_v50  ;;  %vm608_vm10 = vcmp.lt.s32.totalorder %v587_v45, 3 }
 0x13e   :  { %v605_v7 = vor.u32 %v604_v4, %v603_v62  ;;  %v611_v8 = vsel %vm609_vm9, %v599_v3, 2102212464  ;;  %v590_v9 = vshrl.u32 %v1299_v2, %v589_v47  ;;  %v614_v10 = vsel %vm606_vm8, %v593_v63, %v596_v1 }
 0x13f   :  { %v615_v11 = vsel %vm609_vm9, %v602_v5, 920167782  ;;  %v618_v13 = vsel %vm606_vm8, %v596_v1, %v599_v3  ;;  %v532_v14 = vadd.s32 536870912, %v531_v6  ;;  %vm607_vm11 = vcmp.lt.s32.totalorder %v587_v45, 2 }
 0x140   :  { %v616_v12 = vsel %vm608_vm10, %v599_v3, %v615_v11  ;;  %v619_v15 = vsel %vm609_vm9, %v605_v7, 1326507024  ;;  %v610_v16 = vsel %vm606_vm8, %v590_v9, %v593_v63  ;;  %v612_v17 = vsel %vm608_vm10, %v596_v1, %v611_v8 }
 0x141   :  { %v617_v18 = vsel %vm607_vm11, %v614_v10, %v616_v12  ;;  %v620_v19 = vsel %vm608_vm10, %v602_v5, %v619_v15  ;;  %v533_v20 = vshrl.u32 %v532_v14, 30  ;;  %v613_v26 = vsel %vm607_vm11, %v610_v16, %v612_v17 }
 0x142   :  { %v621_v21 = vsel %vm607_vm11, %v618_v13, %v620_v19  ;;  %v1801_v22 = vmul.u32.u64.low %v622_v49, %v617_v18  ;;  %v1802_v23 = vmul.u32.u64.high %v622_v49, %v617_v18, %v1801_v22  ;;  %v629_v29 = vmul.u32 %v622_v49, %v613_v26 }
 0x143   :  { %v1804_v24 = vmul.u32.u64.low %v622_v49, %v621_v21  ;;  %v1805_v25 = vmul.u32.u64.high %v622_v49, %v621_v21, %v1804_v24  ;;  %v534_v2 = vshll.u32 %v533_v20, 30  ;;  %v527_v41 = vadd.s32 %v1790_v43, %v1787_v42 }
 0x144   :  { %v632_v28 = vadd.s32 1, %v1802_v23  ;;  %v557_v63 = vsub.s32 4, %v533_v20  ;;  %vm576_vm2 = vcmp.lt.s32.totalorder %v1767_v52, 0  ;;  %vm575_vm3 = vcmp.le.f32.partialorder %v574_v59, 0.7853982 }
 0x145   :  { %v535_v27 = vsub.s32 %v531_v6, %v534_v2  ;;  %vm631_vm12 = vc.u32 %v1805_v25, %v1801_v22  ;;  %v630_v42 = vadd.s32 %v1801_v22, %v1805_v25  ;;  %vm677_vm5 = vcmask 130048  }
 0x146   :  { %v633_v31 = vsel %vm631_vm12, %v632_v28, %v1802_v23  ;;  %v558_v8 = vsel %vm473_vm15, %v557_v63, %v533_v20  ;;  %vm563_vm11 = vweird.f32 %v1763_v46 }
 0x147   :  { %v537_v30 = vsub.s32 0, %v535_v27  ;;  %v634_v32 = vadd.s32 %v633_v31, %v629_v29  ;;  %v560_v13 = vsel %vm472_vm1, 0, %v558_v8 }
 0x148   :  { %v794_v16 = vadd.s32 3, %v560_v13  ;;  %v564_v21 = vand.u32 3, %v560_v13 }
 0x149   :  { %v954_v33 = vmin.u32 %v537_v30, %v535_v27  ;;  %v635_v34 = vadd.s32 536870912, %v634_v32 }
 0x14a   :  { %v795_v48 = vand.u32 3, %v794_v16  ;;  %vm569_vm4 = vcmp.eq.s32.totalorder %v564_v21, 2  ;;  %vm566_vm7 = vcmp.eq.s32.totalorder %v564_v21, 0  ;;  %vm565_vm9 = vcmp.lt.s32.totalorder %v564_v21, 2 }
 0x14b   :  { %v539_v35 = vclz %v954_v33  ;;  %v636_v36 = vshrl.u32 %v635_v34, 30 }
 0x14c   :  { %vm800_vm6 = vcmp.eq.s32.totalorder %v795_v48, 2  ;;  %vm797_vm8 = vcmp.eq.s32.totalorder %v795_v48, 0  ;;  %vm796_vm10 = vcmp.lt.s32.totalorder %v795_v48, 2 }
 0x14d   :  { %v955_v37 = vadd.s32 4294967294, %v539_v35  ;;  %v637_v38 = vshll.u32 %v636_v36, 30  ;;  %v660_v18 = vsub.s32 4, %v636_v36 }
 0x14f   :  { %vm956_vm13 = vcmp.lt.s32.totalorder %v955_v37, 0  ;;  %v638_v40 = vsub.s32 %v634_v32, %v637_v38  ;;  %v661_v22 = vsel %vm576_vm2, %v660_v18, %v636_v36 }
 0x150   :  { %v542_v39 = vsel %vm956_vm13, 0, %v955_v37  ;;  %v663_v26 = vsel %vm575_vm3, 0, %v661_v22 }
 0x151   :  { %v543_v44 = vsub.s32 32, %v542_v39  ;;  %v547_v45 = vsub.s32 4294967266, %v542_v39  ;;  %v640_v47 = vsub.s32 0, %v638_v40  ;;  %v544_v49 = vshll.u32 %v535_v27, %v542_v39 }
 0x152   :  { %v898_v33 = vadd.s32 3, %v663_v26  ;;  %v667_v38 = vand.u32 3, %v663_v26 }
 0x153   :  { %v545_v50 = vshrl.u32 %v527_v41, %v543_v44  ;;  %v548_v51 = vadd.s32 127, %v547_v45  ;;  %v958_v53 = vmin.u32 %v640_v47, %v638_v40 }
 0x154   :  { %vm672_vm12 = vcmp.eq.s32.totalorder %v667_v38, 2 }
 0x155   :  { %v546_v54 = vor.u32 %v545_v50, %v544_v49  ;;  %v549_v55 = vshll.u32 %v548_v51, 23  ;;  %v642_v56 = vclz %v958_v53 }
 0x157   :  { %v550_v57 = vor.u32 4788187, %v549_v55  ;;  %v959_v58 = vadd.s32 4294967294, %v642_v56  ;;  %v553_v61 = vcvt.s32.f32 %v546_v54 }
 0x159   :  { %v551_v60 = vand.u32 2147483647, %v550_v57  ;;  %vm960_vm14 = vcmp.lt.s32.totalorder %v959_v58, 0 }
 0x15a   :  { %v645_v1 = vsel %vm960_vm14, 0, %v959_v58  ;;  %vm669_vm14 = vcmp.eq.s32.totalorder %v667_v38, 0 }
 0x15b   :  { %v554_v62 = vmul.f32 %v553_v61, %v551_v60  ;;  %v646_v43 = vsub.s32 32, %v645_v1  ;;  %v650_v3 = vsub.s32 4294967266, %v645_v1  ;;  %v647_v0 = vshll.u32 %v638_v40, %v645_v1 }
 0x15c   :  { %v899_v40 = vand.u32 3, %v898_v33 }
 0x15d   :  { %v555_v4 = vxor.u32 2147483648, %v554_v62  ;;  %v648_v5 = vshrl.u32 %v630_v42, %v646_v43  ;;  %v651_v6 = vadd.s32 127, %v650_v3 }
 0x15e   :  { %vm904_vm13 = vcmp.eq.s32.totalorder %v899_v40, 2 }
 0x15f   :  { %v556_v7 = vsel %vm473_vm15, %v555_v4, %v554_v62  ;;  %v649_v10 = vor.u32 %v648_v5, %v647_v0  ;;  %v652_v11 = vshll.u32 %v651_v6, 23  ;;  %vm901_vm15 = vcmp.eq.s32.totalorder %v899_v40, 0 }
 0x160   :  { %v559_v9 = vsel %vm472_vm1, %v1763_v46, %v556_v7  ;;  %vm668_vm1 = vcmp.lt.s32.totalorder %v667_v38, 2 }
 0x161   :  { %1266 = vcosq.f32 %v559_v9  ;;  %v653_v14 = vor.u32 4788187, %v652_v11  ;;  %v656_v15 = vcvt.s32.f32 %v649_v10 }
 0x162   :  { %1268 = vsinq.f32 %v559_v9 }
 0x163   :  { %v654_v12 = vand.u32 2147483647, %v653_v14  ;;  %v470_v14 = vld [vmem:[#allocation3] sm:$0x3] }
 0x165   :  { %v657_v17 = vmul.f32 %v656_v15, %v654_v12 }
 0x167   :  { %v658_v19 = vxor.u32 2147483648, %v657_v17 }
 0x169   :  { %v659_v20 = vsel %vm576_vm2, %v658_v19, %v657_v17  ;;  %vm900_vm2 = vcmp.lt.s32.totalorder %v899_v40, 2 }
 0x16a   :  { %v662_v24 = vsel %vm575_vm3, %v1767_v52, %v659_v20  ;;  %vm666_vm3 = vweird.f32 %v1767_v52 }
 0x16b   :  { %v1267_v23 = vpop.eup %1266  ;;  %1270 = vcosq.f32 %v662_v24 }
 0x16c   :  { %v1269_v25 = vpop.eup %1268  ;;  %v570_v2 = vxor.u32 2147483648, %v1267_v23  ;;  %1272 = vsinq.f32 %v662_v24 }
 0x16d   :  { %v567_v27 = vxor.u32 2147483648, %v1269_v25 }
 0x16e   :  { %v571_v28 = vsel %vm569_vm4, %v570_v2, %v1269_v25  ;;  %v802_v29 = vsel %vm800_vm6, %v570_v2, %v1269_v25  ;;  %vm694_vm4 = vcmask 1041409   ;;  %vm930_vm6 = vcmask 255104  }
 0x16f   :  { %v568_v59 = vsel %vm566_vm7, %v1267_v23, %v567_v27  ;;  %v799_v30 = vsel %vm797_vm8, %v1267_v23, %v567_v27 }
 0x170   :  { %v572_v31 = vsel %vm565_vm9, %v568_v59, %v571_v28  ;;  %v803_v32 = vsel %vm796_vm10, %v799_v30, %v802_v29 }
 0x171   :  { %v573_v34 = vsel %vm563_vm11, nan, %v572_v31  ;;  %v804_v35 = vsel %vm563_vm11, nan, %v803_v32 }
 0x172   :  { %v678_v36 = vsel %vm677_vm5, %v573_v34, 0.0  ;;  %v909_v37 = vsel %vm677_vm5, %v804_v35, 0.0 }
 0x173   :  { %v679_v39 = vrot.slane %v678_v36, 4  ;;  %v910_v41 = vrot.slane %v909_v37, 4 }
 0x175   :  { %v1271_v44 = vpop.eup %1270  ;;  %v680_v50 = vadd.f32 %v679_v39, %v678_v36  ;;  %v911_v46 = vadd.f32 %v910_v41, %v909_v37 }
 0x176   :  { %v1273_v45 = vpop.eup %1272  ;;  %v673_v47 = vxor.u32 2147483648, %v1271_v44 }
 0x177   :  { %v670_v49 = vxor.u32 2147483648, %v1273_v45  ;;  %v681_v60 = vrot.slane %v680_v50, 2  ;;  %v912_v62 = vrot.slane %v911_v46, 2 }
 0x178   :  { %v674_v51 = vsel %vm672_vm12, %v673_v47, %v1273_v45  ;;  %v906_v53 = vsel %vm904_vm13, %v673_v47, %v1273_v45 }
 0x179   :  { %v671_v54 = vsel %vm669_vm14, %v1271_v44, %v670_v49  ;;  %v903_v55 = vsel %vm901_vm15, %v1271_v44, %v670_v49  ;;  %v682_v3 = vadd.f32 %v681_v60, %v680_v50  ;;  %v913_v0 = vadd.f32 %v912_v62, %v911_v46 }
 0x17a   :  { %v675_v56 = vsel %vm668_vm1, %v671_v54, %v674_v51  ;;  %v907_v57 = vsel %vm900_vm2, %v903_v55, %v906_v53 }
 0x17b   :  { %v676_v58 = vsel %vm666_vm3, nan, %v675_v56  ;;  %v908_v61 = vsel %vm666_vm3, nan, %v907_v57  ;;  %v683_v8 = vrot.slane %v682_v3, 1  ;;  %v914_v9 = vrot.slane %v913_v0, 1 }
 0x17c   :  { %v685_v63 = vsel %vm677_vm5, %v676_v58, 0.0  ;;  %v916_v1 = vsel %vm677_vm5, %v908_v61, 0.0  ;;  %vm698_vm5 = vcmask 123904  }
 0x17d   :  { %v686_v42 = vrot.slane %v685_v63, 4  ;;  %v917_v43 = vrot.slane %v916_v1, 4  ;;  %v684_v12 = vadd.f32 %v683_v8, %v682_v3  ;;  %v915_v16 = vadd.f32 %v914_v9, %v913_v0 }
 0x17f   :  { %v687_v4 = vadd.f32 %v686_v42, %v685_v63  ;;  %v918_v5 = vadd.f32 %v917_v43, %v916_v1 }
 0x181   :  { %v688_v6 = vrot.slane %v687_v4, 2  ;;  %v919_v7 = vrot.slane %v918_v5, 2 }
 0x183   :  { %v689_v52 = vadd.f32 %v688_v6, %v687_v4  ;;  %v920_v10 = vadd.f32 %v919_v7, %v918_v5 }
 0x185   :  { %v690_v11 = vrot.slane %v689_v52, 1  ;;  %v921_v13 = vrot.slane %v920_v10, 1 }
 0x187   :  { %v691_v15 = vadd.f32 %v690_v11, %v689_v52  ;;  %v922_v17 = vadd.f32 %v921_v13, %v920_v10 }
 0x189   :  { %v695_v18 = vsel %vm694_vm4, %v691_v15, %v684_v12  ;;  %v925_v19 = vsel %vm694_vm4, %v922_v17, %v915_v16 }
 0x18a   :  { %v697_v21 = vadd.f32 %v695_v18, %v470_v14  ;;  %926 = vrot.lane.b32.xlu0 %v925_v19, %s1305_s0 }
 0x18c   :  { %699 = vst.msk [vmem:[#allocation3] sm:$0x3] %vm698_vm5, %v697_v21 }
 0x193   :  { %v700_v48 = vld [vmem:[#allocation3] sm:$0x3] }
 0x1fc   :  { %v927_v20 = vpop.permute.xlu0 %926 }
 0x1fd   :  { %v929_v22 = vadd.f32 %v927_v20, %v700_v48 }
 0x1ff   :  { %931 = vst.msk [vmem:[#allocation3] sm:$0x3] %vm930_vm6, %v929_v22 }
 0x206   :  { %v935_v23 = vld [vmem:[#allocation3] sm:$0x3] }
 0x207   :  { %v936_v24 = vmul.f32 0.125, %v935_v23 }
 0x209   :  { %938 = vst.msk [vmem:[#allocation3] sm:$0x3] %vm20_vm0, %v936_v24 }
 0x20a   :  { %1285 = shalt.err (!%p1282_p4)
}
 0x20b   :  { %s1286_s8 = scalar_lea.hbm %s1843_s3, 32 }
 0x20c   :  { %p1287_p5 = scmp.ne.s32.totalorder %s1843_s3, %s1286_s8  ;;  %p1290_p6 = scmp.lt.u32.totalorder %s1286_s8, %s1843_s3 }
 0x20e   :  { %p1292_p7 = pnand %p1290_p6, %p1287_p5 }
 0x210   :  { %1295 = shalt.err (!%p1292_p7)
}
 0x211   :  { %948 = dma.vmem_to_hbm [thread:$0]  %s946_s4, 32, %s1843_s3, [#allocation4]  }
 0x212   :  { %1296 = dma.done.wait [#allocation4], 32  }
 0x213   :  { %1297 = vsyncadd [#allocation4], 4294967264 }
 0x214   :  { %952 = vsyncpa [#allocation4], 1 }

</bundles_post_ra>
